<compile_context>
chip_gen: v6e
topology: v6e:2x2x1
jax: 0.10.0
libtpu: 0.0.40
codegen_flags: <defaults>
</compile_context>

<pallas_src>
import functools

import jax
import jax.numpy as jnp
from jax.experimental import pallas as pl
from jax.experimental.pallas import tpu as pltpu


def _vif_ssim_kernel(ph_ref, pwt_ref, vis_ref, inf_ref, fus_ref, out_ref, *,
                     c_const, hout, wout, n_valid, needs_cell_mask,
                     needs_img_mask):
    ph = ph_ref[...]          # (Hout_pad, Hc)  block-mean rows, scaled by 1/k
    pwt = pwt_ref[...]        # (Wc, Wout_pad)  block-mean cols (transposed), 1/k
    G = vis_ref.shape[0]
    hout_pad = ph.shape[0]
    wout_pad = pwt.shape[1]

    C = jnp.float32(c_const)

    # Mask for pooled cells introduced by the (8,128) padding of ph/pwt:
    # those cells evaluate to (C*C)/(C*C) = 1 and must not enter the sum.
    if needs_cell_mask:
        row_ok = jax.lax.broadcasted_iota(jnp.int32, (hout_pad, wout_pad), 0) < hout
        col_ok = jax.lax.broadcasted_iota(jnp.int32, (hout_pad, wout_pad), 1) < wout
        cell_ok = jnp.logical_and(row_ok, col_ok)
    else:
        cell_ok = None

    if needs_img_mask:
        blk = pl.program_id(0)

    def pool(x):
        # (Hout_pad, Hc) @ (Hc, Wc) @ (Wc, Wout_pad) -> (Hout_pad, Wout_pad)
        return jnp.dot(jnp.dot(ph, x, preferred_element_type=jnp.float32),
                       pwt, preferred_element_type=jnp.float32)

    def body(g, acc):
        vis = vis_ref[g]      # (Hc, Wc)
        inf = inf_ref[g]
        fus = fus_ref[g]

        m_v, m_i, m_f = pool(vis), pool(inf), pool(fus)
        e_vv, e_ii, e_ff = pool(vis * vis), pool(inf * inf), pool(fus * fus)
        e_vf, e_if = pool(vis * fus), pool(inf * fus)

        var_v = jnp.abs(e_vv - m_v * m_v)
        var_i = jnp.abs(e_ii - m_i * m_i)
        var_f = jnp.abs(e_ff - m_f * m_f)
        cov_vf = e_vf - m_v * m_f
        cov_if = e_if - m_i * m_f

        # ssim_l * ssim_s as a single ratio; pick num/den, one divide per cell.
        num_vf = (2.0 * m_v * m_f + C) * (cov_vf + C)
        den_vf = (m_v * m_v + m_f * m_f + C) * (var_v + var_f + C)
        num_if = (2.0 * m_i * m_f + C) * (cov_if + C)
        den_if = (m_i * m_i + m_f * m_f + C) * (var_i + var_f + C)

        use_vf = m_v > m_i
        score = jnp.where(use_vf, num_vf, num_if) / jnp.where(use_vf, den_vf, den_if)

        mask = cell_ok
        if needs_img_mask:
            img_ok = blk * G + g < n_valid
            mask = img_ok if mask is None else jnp.logical_and(mask, img_ok)
        if mask is not None:
            score = jnp.where(mask, score, jnp.float32(0.0))
        return acc + score

    acc = jax.lax.fori_loop(
        0, G, body, jnp.zeros((hout_pad, wout_pad), jnp.float32))
    # One cross-lane reduction per grid step; lane-dense partial-sum tile out.
    out_ref[...] = jnp.full(out_ref.shape, jnp.sum(acc), dtype=jnp.float32)


def _vmem_capacity_bytes():
    try:
        info = pltpu.get_tpu_info()
        cap = getattr(info, "vmem_capacity_bytes", None)
        if cap:
            return int(cap)
    except Exception:
        pass
    return 64 * 2 ** 20   # conservative: v7x per-TensorCore VMEM


def vif_ssim_loss(vi_images, ir_images, output_images, *, kernal_size=11,
                  C=0.0009, images_per_block=None):
    """Pallas equivalent of VIF_SSIM_Loss.forward. Inputs: NCHW float32."""
    B, nC, H, W = vi_images.shape
    k = int(kernal_size)
    Hout, Wout = H // k, W // k          # conv2d(valid, stride=k) output size
    Hc, Wc = Hout * k, Wout * k          # extent actually covered by the conv
    N = B * nC

    def prep(x):
        x = x.astype(jnp.float32)
        if (Hc, Wc) != (H, W):           # crop only when H/W aren't multiples of k
            x = x[:, :, :Hc, :Wc]
        return x.reshape(N, Hc, Wc)

    vis, inf, fus = prep(vi_images), prep(ir_images), prep(output_images)

    # Pooled-output dims padded to (8, 128) tile alignment; padded cells are
    # produced by zero rows/cols of ph/pwt and masked inside the kernel.
    Hout_pad = -(-Hout // 8) * 8
    Wout_pad = -(-Wout // 128) * 128

    img_bytes = Hc * Wc * 4
    vmem_budget = int(0.7 * _vmem_capacity_bytes())          # headroom for Mosaic
    vmem_budget = max(24 * 2 ** 20, min(vmem_budget, 96 * 2 ** 20))

    # VMEM model per grid step: 3 inputs double-buffered (6*G*img) plus a few
    # image-sized live temporaries inside one fori_loop iteration + pooled tiles.
    fixed_bytes = 6 * img_bytes + 16 * Hout_pad * Wout_pad * 4 + (2 << 20)

    if images_per_block is None:
        target_in_bytes = 4 << 20       # ~4 MiB of fresh input per grid step
        g_target = max(1, target_in_bytes // max(3 * img_bytes, 1))
        g_vmem = max(1, (vmem_budget - fixed_bytes) // max(6 * img_bytes, 1))
        G = int(min(g_target, g_vmem, N, 64))
        if N >= 2:                      # keep >= 2 grid steps (2 TCs on v7x)
            G = min(G, -(-N // 2))
        G = max(G, 1)
    else:
        G = int(max(1, min(images_per_block, N)))

    num_blocks = -(-N // G)             # ceil
    N_pad = num_blocks * G
    if N_pad != N:
        pad = ((0, N_pad - N), (0, 0), (0, 0))
        vis, inf, fus = jnp.pad(vis, pad), jnp.pad(inf, pad), jnp.pad(fus, pad)

    # Pooling (block-mean) matrices with 1/k folded in (net scale = 1/k^2).
    # Rows >= Hout / cols >= Wout are all-zero (padding).
    inv_k = jnp.float32(1.0 / k)
    ph = ((jnp.arange(Hout_pad)[:, None] == (jnp.arange(Hc)[None, :] // k))
          .astype(jnp.float32) * inv_k)                           # (Hout_pad, Hc)
    pwt = (((jnp.arange(Wc)[:, None] // k) == jnp.arange(Wout_pad)[None, :])
           .astype(jnp.float32) * inv_k)                          # (Wc, Wout_pad)

    kernel = functools.partial(
        _vif_ssim_kernel, c_const=float(C), hout=Hout, wout=Wout, n_valid=N,
        needs_cell_mask=(Hout_pad != Hout) or (Wout_pad != Wout),
        needs_img_mask=(N_pad != N))

    vmem_limit = int(min(vmem_budget,
                         max(32 * 2 ** 20, 6 * G * img_bytes + fixed_bytes)))

    partials = pl.pallas_call(
        kernel,
        out_shape=jax.ShapeDtypeStruct((num_blocks, 8, 128), jnp.float32),
        grid_spec=pltpu.PrefetchScalarGridSpec(
            num_scalar_prefetch=0,
            grid=(num_blocks,),
            in_specs=[
                pl.BlockSpec((Hout_pad, Hc), lambda i: (0, 0)),
                pl.BlockSpec((Wc, Wout_pad), lambda i: (0, 0)),
                pl.BlockSpec((G, Hc, Wc), lambda i: (i, 0, 0)),
                pl.BlockSpec((G, Hc, Wc), lambda i: (i, 0, 0)),
                pl.BlockSpec((G, Hc, Wc), lambda i: (i, 0, 0)),
            ],
            out_specs=pl.BlockSpec((1, 8, 128), lambda i: (i, 0, 0)),
        ),
        compiler_params=pltpu.CompilerParams(
            dimension_semantics=("parallel",),
            vmem_limit_bytes=vmem_limit,
        ),
    )(ph, pwt, vis, inf, fus)

    total = jnp.sum(partials[:, 0, 0])
    return 1.0 - total / jnp.float32(N * Hout * Wout)


def _reference_loss(vi, ir, fu, *, k, C):
    """Pure-JAX reference mirroring the PyTorch forward."""
    B, nC, H, W = vi.shape
    Hout, Wout = H // k, W // k

    def pool(x):
        x = x[:, :, :Hout * k, :Wout * k].reshape(B, nC, Hout, k, Wout, k)
        return x.mean(axis=(3, 5))

    m_v, m_i, m_f = pool(vi), pool(ir), pool(fu)
    var_v = jnp.abs(pool(vi * vi) - m_v ** 2)
    var_i = jnp.abs(pool(ir * ir) - m_i ** 2)
    var_f = jnp.abs(pool(fu * fu) - m_f ** 2)
    cov_vf = pool(vi * fu) - m_v * m_f
    cov_if = pool(ir * fu) - m_i * m_f
    l_vf = (2 * m_v * m_f + C) / (m_v ** 2 + m_f ** 2 + C)
    l_if = (2 * m_i * m_f + C) / (m_i ** 2 + m_f ** 2 + C)
    s_vf = (cov_vf + C) / (var_v + var_f + C)
    s_if = (cov_if + C) / (var_i + var_f + C)
    score = jnp.where(m_v > m_i, l_vf * s_vf, l_if * s_if)
    return 1.0 - score.mean()


if __name__ == "__main__":
    # Small deterministic inputs: batch=2, channels=2, spatial=22 (k=11 -> 2x2 patches).
    key = jax.random.PRNGKey(0)
    k1, k2, k3 = jax.random.split(key, 3)
    B, nC, H, W = 2, 2, 22, 22
    vi = jax.random.uniform(k1, (B, nC, H, W), dtype=jnp.float32)
    ir = jax.random.uniform(k2, (B, nC, H, W), dtype=jnp.float32)
    fu = jax.random.uniform(k3, (B, nC, H, W), dtype=jnp.float32)

    # images_per_block=2 -> grid of 2 parallel steps (exercises partial sums).
    loss = vif_ssim_loss(vi, ir, fu, kernal_size=11, C=0.0009, images_per_block=2)
    loss = jax.block_until_ready(loss)
    ref = _reference_loss(vi, ir, fu, k=11, C=0.0009)
    assert jnp.allclose(loss, ref, rtol=1e-4, atol=1e-4), (loss, ref)

    # Exercise the default block-size heuristic and the padded-image mask path
    # (N = 3 images -> 2 grid steps, one zero-padded image masked in-kernel).
    vi2 = vi.reshape(-1, 1, H, W)[:3]
    ir2 = ir.reshape(-1, 1, H, W)[:3]
    fu2 = fu.reshape(-1, 1, H, W)[:3]
    loss2 = jax.block_until_ready(
        vif_ssim_loss(vi2, ir2, fu2, kernal_size=11, C=0.0009))
    ref2 = _reference_loss(vi2, ir2, fu2, k=11, C=0.0009)
    assert jnp.allclose(loss2, ref2, rtol=1e-4, atol=1e-4), (loss2, ref2)

    print("KERNEL_OK")
</pallas_src>

<mosaic_0001>
module attributes {stable_mosaic.version = 11 : i64} {
  func.func @_vif_ssim_kernel(%arg0: i32, %arg1: memref<8x22xf32, #tpu.memory_space<vmem>>, %arg2: memref<22x128xf32, #tpu.memory_space<vmem>>, %arg3: memref<2x22x22xf32, #tpu.memory_space<vmem>>, %arg4: memref<2x22x22xf32, #tpu.memory_space<vmem>>, %arg5: memref<2x22x22xf32, #tpu.memory_space<vmem>>, %arg6: memref<1x8x128xf32, #tpu.memory_space<vmem>>) attributes {dimension_semantics = [#tpu.dimension_semantics<parallel>], iteration_bounds = array<i64: 2>, scalar_prefetch = 0 : i64, scratch_operands = 0 : i64, tpu.core_type = #tpu.core_type<tc>, window_params = [{pipeline_mode = #tpu.pipeline_mode<synchronous>, transform_indices = @transform_0, window_bounds = array<i64: 8, 22>}, {pipeline_mode = #tpu.pipeline_mode<synchronous>, transform_indices = @transform_1, window_bounds = array<i64: 22, 128>}, {transform_indices = @transform_2, window_bounds = array<i64: 2, 22, 22>}, {transform_indices = @transform_3, window_bounds = array<i64: 2, 22, 22>}, {transform_indices = @transform_4, window_bounds = array<i64: 2, 22, 22>}, {transform_indices = @transform_5, window_bounds = array<i64: 1, 8, 128>}]} {
    %c0 = arith.constant 0 : index
    %c0_0 = arith.constant 0 : index
    %0 = vector.load %arg1[%c0, %c0_0] : memref<8x22xf32, #tpu.memory_space<vmem>>, vector<8x22xf32>
    %c0_1 = arith.constant 0 : index
    %c0_2 = arith.constant 0 : index
    %1 = vector.load %arg2[%c0_1, %c0_2] : memref<22x128xf32, #tpu.memory_space<vmem>>, vector<22x128xf32>
    %2 = tpu.iota {dimensions = array<i32: 0>} : vector<8x128xi32>
    %c2_i32 = arith.constant 2 : i32
    %3 = vector.broadcast %c2_i32 : i32 to vector<8x128xi32>
    %4 = arith.cmpi slt, %2, %3 : vector<8x128xi32>
    %5 = tpu.iota {dimensions = array<i32: 1>} : vector<8x128xi32>
    %c2_i32_3 = arith.constant 2 : i32
    %6 = vector.broadcast %c2_i32_3 : i32 to vector<8x128xi32>
    %7 = arith.cmpi slt, %5, %6 : vector<8x128xi32>
    %8 = arith.andi %4, %7 : vector<8x128xi1>
    %cst = arith.constant 0.000000e+00 : f32
    %9 = vector.broadcast %cst : f32 to vector<8x128xf32>
    %cst_4 = arith.constant 8.99999984E-4 : f32
    %c0_i32 = arith.constant 0 : i32
    %c2_i32_5 = arith.constant 2 : i32
    %10 = arith.addi %c0_i32, %c2_i32_5 : i32
    %c1_i32 = arith.constant 1 : i32
    %11 = scf.for %arg7 = %c0_i32 to %10 step %c1_i32 iter_args(%arg8 = %9) -> (vector<8x128xf32>)  : i32 {
      %18 = arith.index_cast %arg7 : i32 to index
      %c0_11 = arith.constant 0 : index
      %c0_12 = arith.constant 0 : index
      %19 = vector.load %arg3[%18, %c0_11, %c0_12] : memref<2x22x22xf32, #tpu.memory_space<vmem>>, vector<1x22x22xf32>
      %20 = vector.shape_cast %19 : vector<1x22x22xf32> to vector<22x22xf32>
      %21 = arith.index_cast %arg7 : i32 to index
      %c0_13 = arith.constant 0 : index
      %c0_14 = arith.constant 0 : index
      %22 = vector.load %arg4[%21, %c0_13, %c0_14] : memref<2x22x22xf32, #tpu.memory_space<vmem>>, vector<1x22x22xf32>
      %23 = vector.shape_cast %22 : vector<1x22x22xf32> to vector<22x22xf32>
      %24 = arith.index_cast %arg7 : i32 to index
      %c0_15 = arith.constant 0 : index
      %c0_16 = arith.constant 0 : index
      %25 = vector.load %arg5[%24, %c0_15, %c0_16] : memref<2x22x22xf32, #tpu.memory_space<vmem>>, vector<1x22x22xf32>
      %26 = vector.shape_cast %25 : vector<1x22x22xf32> to vector<22x22xf32>
      %cst_17 = arith.constant dense<0.000000e+00> : vector<8x22xf32>
      %27 = tpu.matmul %0, %20, %cst_17 {dimension_numbers = #tpu.dot_dimension_numbers<[1], [0], [0], [1], [0, 0, 1, 1], [], []>} : vector<8x22xf32>, vector<22x22xf32>, vector<8x22xf32> -> vector<8x22xf32>
      %cst_18 = arith.constant dense<0.000000e+00> : vector<8x128xf32>
      %28 = tpu.matmul %27, %1, %cst_18 {dimension_numbers = #tpu.dot_dimension_numbers<[1], [0], [0], [1], [0, 0, 1, 1], [], []>} : vector<8x22xf32>, vector<22x128xf32>, vector<8x128xf32> -> vector<8x128xf32>
      %cst_19 = arith.constant dense<0.000000e+00> : vector<8x22xf32>
      %29 = tpu.matmul %0, %23, %cst_19 {dimension_numbers = #tpu.dot_dimension_numbers<[1], [0], [0], [1], [0, 0, 1, 1], [], []>} : vector<8x22xf32>, vector<22x22xf32>, vector<8x22xf32> -> vector<8x22xf32>
      %cst_20 = arith.constant dense<0.000000e+00> : vector<8x128xf32>
      %30 = tpu.matmul %29, %1, %cst_20 {dimension_numbers = #tpu.dot_dimension_numbers<[1], [0], [0], [1], [0, 0, 1, 1], [], []>} : vector<8x22xf32>, vector<22x128xf32>, vector<8x128xf32> -> vector<8x128xf32>
      %cst_21 = arith.constant dense<0.000000e+00> : vector<8x22xf32>
      %31 = tpu.matmul %0, %26, %cst_21 {dimension_numbers = #tpu.dot_dimension_numbers<[1], [0], [0], [1], [0, 0, 1, 1], [], []>} : vector<8x22xf32>, vector<22x22xf32>, vector<8x22xf32> -> vector<8x22xf32>
      %cst_22 = arith.constant dense<0.000000e+00> : vector<8x128xf32>
      %32 = tpu.matmul %31, %1, %cst_22 {dimension_numbers = #tpu.dot_dimension_numbers<[1], [0], [0], [1], [0, 0, 1, 1], [], []>} : vector<8x22xf32>, vector<22x128xf32>, vector<8x128xf32> -> vector<8x128xf32>
      %33 = arith.mulf %20, %20 : vector<22x22xf32>
      %cst_23 = arith.constant dense<0.000000e+00> : vector<8x22xf32>
      %34 = tpu.matmul %0, %33, %cst_23 {dimension_numbers = #tpu.dot_dimension_numbers<[1], [0], [0], [1], [0, 0, 1, 1], [], []>} : vector<8x22xf32>, vector<22x22xf32>, vector<8x22xf32> -> vector<8x22xf32>
      %cst_24 = arith.constant dense<0.000000e+00> : vector<8x128xf32>
      %35 = tpu.matmul %34, %1, %cst_24 {dimension_numbers = #tpu.dot_dimension_numbers<[1], [0], [0], [1], [0, 0, 1, 1], [], []>} : vector<8x22xf32>, vector<22x128xf32>, vector<8x128xf32> -> vector<8x128xf32>
      %36 = arith.mulf %23, %23 : vector<22x22xf32>
      %cst_25 = arith.constant dense<0.000000e+00> : vector<8x22xf32>
      %37 = tpu.matmul %0, %36, %cst_25 {dimension_numbers = #tpu.dot_dimension_numbers<[1], [0], [0], [1], [0, 0, 1, 1], [], []>} : vector<8x22xf32>, vector<22x22xf32>, vector<8x22xf32> -> vector<8x22xf32>
      %cst_26 = arith.constant dense<0.000000e+00> : vector<8x128xf32>
      %38 = tpu.matmul %37, %1, %cst_26 {dimension_numbers = #tpu.dot_dimension_numbers<[1], [0], [0], [1], [0, 0, 1, 1], [], []>} : vector<8x22xf32>, vector<22x128xf32>, vector<8x128xf32> -> vector<8x128xf32>
      %39 = arith.mulf %26, %26 : vector<22x22xf32>
      %cst_27 = arith.constant dense<0.000000e+00> : vector<8x22xf32>
      %40 = tpu.matmul %0, %39, %cst_27 {dimension_numbers = #tpu.dot_dimension_numbers<[1], [0], [0], [1], [0, 0, 1, 1], [], []>} : vector<8x22xf32>, vector<22x22xf32>, vector<8x22xf32> -> vector<8x22xf32>
      %cst_28 = arith.constant dense<0.000000e+00> : vector<8x128xf32>
      %41 = tpu.matmul %40, %1, %cst_28 {dimension_numbers = #tpu.dot_dimension_numbers<[1], [0], [0], [1], [0, 0, 1, 1], [], []>} : vector<8x22xf32>, vector<22x128xf32>, vector<8x128xf32> -> vector<8x128xf32>
      %42 = arith.mulf %20, %26 : vector<22x22xf32>
      %cst_29 = arith.constant dense<0.000000e+00> : vector<8x22xf32>
      %43 = tpu.matmul %0, %42, %cst_29 {dimension_numbers = #tpu.dot_dimension_numbers<[1], [0], [0], [1], [0, 0, 1, 1], [], []>} : vector<8x22xf32>, vector<22x22xf32>, vector<8x22xf32> -> vector<8x22xf32>
      %cst_30 = arith.constant dense<0.000000e+00> : vector<8x128xf32>
      %44 = tpu.matmul %43, %1, %cst_30 {dimension_numbers = #tpu.dot_dimension_numbers<[1], [0], [0], [1], [0, 0, 1, 1], [], []>} : vector<8x22xf32>, vector<22x128xf32>, vector<8x128xf32> -> vector<8x128xf32>
      %45 = arith.mulf %23, %26 : vector<22x22xf32>
      %cst_31 = arith.constant dense<0.000000e+00> : vector<8x22xf32>
      %46 = tpu.matmul %0, %45, %cst_31 {dimension_numbers = #tpu.dot_dimension_numbers<[1], [0], [0], [1], [0, 0, 1, 1], [], []>} : vector<8x22xf32>, vector<22x22xf32>, vector<8x22xf32> -> vector<8x22xf32>
      %cst_32 = arith.constant dense<0.000000e+00> : vector<8x128xf32>
      %47 = tpu.matmul %46, %1, %cst_32 {dimension_numbers = #tpu.dot_dimension_numbers<[1], [0], [0], [1], [0, 0, 1, 1], [], []>} : vector<8x22xf32>, vector<22x128xf32>, vector<8x128xf32> -> vector<8x128xf32>
      %48 = arith.mulf %28, %28 : vector<8x128xf32>
      %49 = arith.subf %35, %48 : vector<8x128xf32>
      %50 = math.absf %49 : vector<8x128xf32>
      %51 = arith.mulf %30, %30 : vector<8x128xf32>
      %52 = arith.subf %38, %51 : vector<8x128xf32>
      %53 = math.absf %52 : vector<8x128xf32>
      %54 = arith.mulf %32, %32 : vector<8x128xf32>
      %55 = arith.subf %41, %54 : vector<8x128xf32>
      %56 = math.absf %55 : vector<8x128xf32>
      %57 = arith.mulf %28, %32 : vector<8x128xf32>
      %58 = arith.subf %44, %57 : vector<8x128xf32>
      %59 = arith.mulf %30, %32 : vector<8x128xf32>
      %60 = arith.subf %47, %59 : vector<8x128xf32>
      %cst_33 = arith.constant 2.000000e+00 : f32
      %61 = vector.broadcast %cst_33 : f32 to vector<8x128xf32>
      %62 = arith.mulf %61, %28 : vector<8x128xf32>
      %63 = arith.mulf %62, %32 : vector<8x128xf32>
      %64 = vector.broadcast %cst_4 : f32 to vector<8x128xf32>
      %65 = arith.addf %63, %64 : vector<8x128xf32>
      %66 = vector.broadcast %cst_4 : f32 to vector<8x128xf32>
      %67 = arith.addf %58, %66 : vector<8x128xf32>
      %68 = arith.mulf %65, %67 : vector<8x128xf32>
      %69 = arith.mulf %28, %28 : vector<8x128xf32>
      %70 = arith.mulf %32, %32 : vector<8x128xf32>
      %71 = arith.addf %69, %70 : vector<8x128xf32>
      %72 = vector.broadcast %cst_4 : f32 to vector<8x128xf32>
      %73 = arith.addf %71, %72 : vector<8x128xf32>
      %74 = arith.addf %50, %56 : vector<8x128xf32>
      %75 = vector.broadcast %cst_4 : f32 to vector<8x128xf32>
      %76 = arith.addf %74, %75 : vector<8x128xf32>
      %77 = arith.mulf %73, %76 : vector<8x128xf32>
      %cst_34 = arith.constant 2.000000e+00 : f32
      %78 = vector.broadcast %cst_34 : f32 to vector<8x128xf32>
      %79 = arith.mulf %78, %30 : vector<8x128xf32>
      %80 = arith.mulf %79, %32 : vector<8x128xf32>
      %81 = vector.broadcast %cst_4 : f32 to vector<8x128xf32>
      %82 = arith.addf %80, %81 : vector<8x128xf32>
      %83 = vector.broadcast %cst_4 : f32 to vector<8x128xf32>
      %84 = arith.addf %60, %83 : vector<8x128xf32>
      %85 = arith.mulf %82, %84 : vector<8x128xf32>
      %86 = arith.mulf %30, %30 : vector<8x128xf32>
      %87 = arith.mulf %32, %32 : vector<8x128xf32>
      %88 = arith.addf %86, %87 : vector<8x128xf32>
      %89 = vector.broadcast %cst_4 : f32 to vector<8x128xf32>
      %90 = arith.addf %88, %89 : vector<8x128xf32>
      %91 = arith.addf %53, %56 : vector<8x128xf32>
      %92 = vector.broadcast %cst_4 : f32 to vector<8x128xf32>
      %93 = arith.addf %91, %92 : vector<8x128xf32>
      %94 = arith.mulf %90, %93 : vector<8x128xf32>
      %95 = arith.cmpf ogt, %28, %30 : vector<8x128xf32>
      %96 = arith.select %95, %68, %85 : vector<8x128xi1>, vector<8x128xf32>
      %97 = arith.select %95, %77, %94 : vector<8x128xi1>, vector<8x128xf32>
      %98 = arith.divf %96, %97 : vector<8x128xf32>
      %cst_35 = arith.constant 0.000000e+00 : f32
      %99 = vector.broadcast %cst_35 : f32 to vector<8x128xf32>
      %100 = arith.select %8, %98, %99 : vector<8x128xi1>, vector<8x128xf32>
      %101 = arith.addf %arg8, %100 : vector<8x128xf32>
      scf.yield %101 : vector<8x128xf32>
    }
    %c2_i32_6 = arith.constant 2 : i32
    %12 = vector.shape_cast %11 : vector<8x128xf32> to vector<1x8x128xf32>
    %cst_7 = arith.constant dense<0.000000e+00> : vector<1xf32>
    %13 = vector.multi_reduction <add>, %12, %cst_7 [1, 2] : vector<1x8x128xf32> to vector<1xf32>
    %14 = vector.shape_cast %13 : vector<1xf32> to vector<1x1x1xf32>
    %15 = vector.extract %14[0, 0, 0] : f32 from vector<1x1x1xf32>
    %16 = vector.broadcast %15 : f32 to vector<1x8x128xf32>
    %c0_8 = arith.constant 0 : index
    %c0_9 = arith.constant 0 : index
    %c0_10 = arith.constant 0 : index
    %17 = vector.load %arg6[%c0_8, %c0_9, %c0_10] : memref<1x8x128xf32, #tpu.memory_space<vmem>>, vector<1x8x128xf32>
    tpu.vector_store %arg6[%c0_8, %c0_9, %c0_10], %16 {strides = array<i32>} : memref<1x8x128xf32, #tpu.memory_space<vmem>>, vector<1x8x128xf32>,
    return
  }
  func.func @transform_0(%arg0: i32) -> (i32, i32) {
    %c0_i32 = arith.constant 0 : i32
    %c0_i32_0 = arith.constant 0 : i32
    %c0_i32_1 = arith.constant 0 : i32
    return %c0_i32, %c0_i32_0 : i32, i32
  }
  func.func @transform_1(%arg0: i32) -> (i32, i32) {
    %c0_i32 = arith.constant 0 : i32
    %c0_i32_0 = arith.constant 0 : i32
    %c0_i32_1 = arith.constant 0 : i32
    return %c0_i32, %c0_i32_0 : i32, i32
  }
  func.func @transform_2(%arg0: i32) -> (i32, i32, i32) {
    %c0_i32 = arith.constant 0 : i32
    %c0_i32_0 = arith.constant 0 : i32
    %c0_i32_1 = arith.constant 0 : i32
    return %arg0, %c0_i32, %c0_i32_0 : i32, i32, i32
  }
  func.func @transform_3(%arg0: i32) -> (i32, i32, i32) {
    %c0_i32 = arith.constant 0 : i32
    %c0_i32_0 = arith.constant 0 : i32
    %c0_i32_1 = arith.constant 0 : i32
    return %arg0, %c0_i32, %c0_i32_0 : i32, i32, i32
  }
  func.func @transform_4(%arg0: i32) -> (i32, i32, i32) {
    %c0_i32 = arith.constant 0 : i32
    %c0_i32_0 = arith.constant 0 : i32
    %c0_i32_1 = arith.constant 0 : i32
    return %arg0, %c0_i32, %c0_i32_0 : i32, i32, i32
  }
  func.func @transform_5(%arg0: i32) -> (i32, i32, i32) {
    %c0_i32 = arith.constant 0 : i32
    %c0_i32_0 = arith.constant 0 : i32
    %c0_i32_1 = arith.constant 0 : i32
    return %arg0, %c0_i32, %c0_i32_0 : i32, i32, i32
  }
}

</mosaic_0001>

<bundles_post_ra>
// kernel: tpu_custom_call.1
= control target key start
LH: loop header
LB: loop body
LE: loop exit
PB: predicated region body
PF: predicated region fallthrough
CT: control target
= control target key end

     0   :  { %10 = vsyncpa [#allocation3], 0  ;;  %s2444_s0 = inlined_call_operand.vmem [shape: f32[8,22], index: 0, kind: input, shape index: {}]   ;;  %s2445_s1 = inlined_call_operand.vmem [shape: f32[22,128], index: 1, kind: input, shape index: {}]   ;;  %s2446_s2 = inlined_call_operand.vmem [shape: f32[4,22,22], index: 2, kind: input, shape index: {}]   ;;  %s2447_s3 = inlined_call_operand.vmem [shape: f32[4,22,22], index: 3, kind: input, shape index: {}]   ;;  %s2448_s4 = inlined_call_operand.vmem [shape: f32[4,22,22], index: 4, kind: input, shape index: {}]   ;;  %s2449_s5 = inlined_call_operand.hbm [shape: f32[2,8,128], index: 5, kind: output, shape index: {}]  }
   0x1   :  { %12 = vsyncpa [#allocation3 + $0x1], 0  ;;  %s2090_s18 = smov 0   ;;  %s2092_s19 = smov 0  }
   0x2   :  { %s2094_s20 = smov 0   ;;  %s2096_s21 = smov 0  }
   0x3 LB: > { %s2111_s22 = sadd.s32 4294967295, %s2047_s21   ;;  %s1662_s23 = sadd.s32 4294967294, %s2047_s21   ;;  %s2047_s21 = sphi %s2096_s21, %s2458_s21   ;;  %s2043_s20 = sphi %s2094_s20, %s2457_s20   ;;  %s2039_s19 = sphi %s2092_s19, %s2456_s19   ;;  %s2035_s18 = sphi %s2090_s18, %s2455_s18  }
   0x4   : > { %s2115_s24 = sadd.s32 1, %s2047_s21   ;;  %s145_s25 = sadd.s32 1, %s2043_s20 }
   0x5   : > { %s142_s26 = ssub.s32 %s2047_s21, %s2115_s24  ;;  %p155_p0 = scmp.ne.s32.totalorder %s2043_s20, %s2039_s19 }
   0x6   : > { %p143_p1 = scmp.eq.s32.totalorder %s142_s26, 0  ;;  %p156_p2 = scmp.eq.s32.totalorder %s2111_s22, 1 }
   0x7   : > { %p161_p3 = scmp.ne.s32.totalorder %s2039_s19, %s2035_s18  ;;  %p162_p4 = scmp.eq.s32.totalorder %s1662_s23, 1 }
   0x8   : > { %s2126_s27 = scalar_select %p143_p1, %s2043_s20, %s145_s25  }
   0x9   : > { %p2128_p5 = por %p156_p2, %p155_p0  ;;  %p2132_p6 = por %p162_p4, %p161_p3 }
   0xa   : > { %p1665_p7 = scmp.ge.s32.totalorder %s2047_s21, 1  ;;  %p216_p8 = scmp.lt.s32.totalorder %s2047_s21, 3 }
   0xc   : > { %p217_p9 = pnand %p1665_p7, %p216_p8 }
   0xd   : > { %s254_s30 = sand.u32 (!%p217_p9), 1, %s2039_s19   ;;  %s1667_s6 = sshll.u32 (!%p217_p9), %s2111_s22, 1 }
   0xe   : > { %220 = sbr.rel (%p217_p9) target bundleno = 694 (0x2b6), region = 40  ;;  %s2157_s13 = sshll.u32 (!%p217_p9), %s254_s30, 3 }
   0xf   : > { %p258_p10 = scmp.lt.s32.totalorder (!%p217_p9), %s1667_s6, 3  ;;  %s256_s11 = scalar_lea.vmem (!%p217_p9), [#allocation2], %s2157_s13 }
  0x10   : > { %s2185_s12 = smov (!%p217_p9), 0  }
  0x13   : > { %v2143_v0 = vld [vmem:[%s2444_s0] sm:$0xff]  ;;  %v2153_v2 = vld [vmem:[%s2445_s1 + $0x8] sm:$0xff]  ;;  %v282_v3 = vlaneseq  ;;  %v2162_v4 = vld [vmem:[%s2445_s1 + $0x10] sm:$0x3f]  ;;  %s2460_s6 = smov (!%p258_p10, %s1667_s6), 3  ;;  %v2183_v8 = vmov 0.0  }
  0x14   : > { %v2148_v1 = vld [vmem:[%s2445_s1] sm:$0xff]  ;;  %s2164_s16 = smul.u32 24, %s2460_s6 }
  0x15   : > { %v283_v5 = vshrl.u32 %v282_v3, 7  ;;  %v286_v6 = vand.u32 127, %v282_v3 }
  0x16   : > { %s262_s25 = scalar_lea.vmem %s2446_s2, %s2164_s16  ;;  %s269_s8 = scalar_lea.vmem %s2447_s3, %s2164_s16 }
  0x17   : > { %vm284_vm0 = vcmp.lt.s32.totalorder %v283_v5, 2  ;;  %vm287_vm1 = vcmp.lt.s32.totalorder %v286_v6, 2  ;;  %s276_s6 = scalar_lea.vmem %s2448_s4, %s2164_s16 }
  0x18   : > { %vm2166_vm2 = vmand %vm284_vm0, %vm287_vm1 }
  0x19 LB: >> { %v2057_v9 = vmov 0.0   ;;  %vm2058_vm3 = vmmov 0   ;;  %s296_s14 = smul.u32 24, %s2055_s12  ;;  %vm313_vm4 = vcmask 1045504   ;;  %vm309_vm5 = vcmask 179200   ;;  %s294_s12 = sadd.s32 1, %s2055_s12   ;;  %s2055_s12 = sphi %s2185_s12, %s294_s12   ;;  %v2051_v8 = vphi %v2183_v8, %v2454_v8  }
  0x1a   : >> { %1773 = vmatprep.subr.mxu0 %v2057_v9  ;;  %1779 = vmatprep.mubr.msk.f32.mxu0 %vm2058_vm3, %v2057_v9  ;;  %p291_p11 = scmp.ge.s32.totalorder %s294_s12, 2  }
  0x1b   : >> { %1782 = vmatprep.subr.mxu1 %v2057_v9  ;;  %1788 = vmatprep.mubr.msk.f32.mxu1 %vm2058_vm3, %v2057_v9  ;;  %s297_s23 = scalar_lea.vmem %s262_s25, %s296_s14  ;;  %s301_s9 = scalar_lea.vmem %s269_s8, %s296_s14 }
  0x1c   : >> { %1783 = vmatpush3.msk.msra.mxu1 %vm313_vm4, %v2162_v4  ;;  %v2208_v10 = vld [vmem:[%s297_s23 + $0x10] sm:$0x3f]  ;;  %v2210_v11 = vld [vmem:[%s297_s23 + $0x8] sm:$0xff]  ;;  %v2221_v12 = vld [vmem:[%s297_s23] sm:$0xff]  ;;  %s305_s17 = scalar_lea.vmem %s276_s6, %s296_s14  ;;  %s1706_s14 = sshll.u32 (%p291_p11), %s2111_s22, 7 }
  0x1d   : >> { %1784 = vmatprep.subr.mxu1 %v2057_v9  ;;  %1774 = vmatpush3.msk.msra.mxu0 %vm313_vm4, %v2208_v10  ;;  %v2225_v13 = vld [vmem:[%s301_s9 + $0x10] sm:$0x3f]  ;;  %v2233_v14 = vld [vmem:[%s301_s9 + $0x8] sm:$0xff]  ;;  %v2245_v15 = vld [vmem:[%s301_s9] sm:$0xff]  ;;  %v757_v19 = vmul.f32 %v2208_v10, %v2208_v10  ;;  %v756_v20 = vmul.f32 %v2210_v11, %v2210_v11  ;;  %v755_v21 = vmul.f32 %v2221_v12, %v2221_v12  ;;  %s1565_s23 = sshll.u32 (%p291_p11), %s256_s11, 4  ;;  %s2405_s16 = scalar_lea.hbm (%p291_p11), %s2449_s5, %s1706_s14  ;;  %s1566_s23 = int_to_ptr.vmem [resolvable:$true] %s1565_s23 }
  0x1e   : >> { %1785 = vmatpush3.msra.mxu1 %v2153_v2  ;;  %1775 = vmatprep.subr.mxu0 %v2057_v9  ;;  %v308_v16 = vld [vmem:[%s305_s17 + $0x10] sm:$0x3f]  ;;  %v307_v17 = vld [vmem:[%s305_s17 + $0x8] sm:$0xff]  ;;  %v306_v18 = vld [vmem:[%s305_s17] sm:$0xff]  ;;  %v906_v22 = vmul.f32 %v2225_v13, %v2225_v13  ;;  %v905_v23 = vmul.f32 %v2233_v14, %v2233_v14  ;;  %v904_v24 = vmul.f32 %v2245_v15, %v2245_v15  ;;  %s1552_s8 = scalar_lea.sflag (%p291_p11), [#allocation3], %s254_s30  ;;  %s1979_s6 = scalar_lea.vmem (%p291_p11), %s1566_s23, 128 }
  0x1f   : >> { %1776 = vmatpush3.msra.mxu0 %v2210_v11  ;;  %1786 = vmatprep.subr.mxu1 %v2057_v9  ;;  %v1055_v25 = vmul.f32 %v308_v16, %v308_v16  ;;  %v1054_v26 = vmul.f32 %v307_v17, %v307_v17  ;;  %v1053_v27 = vmul.f32 %v306_v18, %v306_v18  ;;  %p1980_p12 = scmp.ne.s32.totalorder (%p291_p11), %s1566_s23, %s1979_s6  ;;  %s2059_s22 = smov (%p291_p11), [#allocation2]  }
  0x20   : >> { %1777 = vmatprep.subr.mxu0 %v2057_v9  ;;  %1787 = vmatpush3.msra.mxu1 %v2148_v1  ;;  %v1204_v28 = vmul.f32 %v308_v16, %v2208_v10  ;;  %v1203_v29 = vmul.f32 %v307_v17, %v2210_v11  ;;  %v1202_v30 = vmul.f32 %v306_v18, %v2221_v12  ;;  %s1983_s7 = sshll.u32 (%p291_p11), %s2059_s22, 4  ;;  %s1984_s7 = int_to_ptr.vmem [resolvable:$false] %s1983_s7 }
  0x21   : >> { %1778 = vmatpush3.msra.mxu0 %v2221_v12  ;;  %1800 = vmatprep.subr.mxu1 %v2057_v9  ;;  %v1353_v31 = vmul.f32 %v308_v16, %v2225_v13  ;;  %v1352_v32 = vmul.f32 %v307_v17, %v2233_v14  ;;  %v1351_v33 = vmul.f32 %v306_v18, %v2245_v15  ;;  %p1981_p13 = pnand (%p291_p11), %p1980_p12, %p2128_p5  ;;  %s1985_s9 = scalar_lea.vmem (%p291_p11), %s1984_s7, 256 }
  0x22   : >> { %1780 = vmatmul.mubr.msk.f32.vlgmr.msra.gmra.mxu0 %vm309_vm5, %v2143_v0  ;;  %1791 = vmatprep.subr.mxu0 %v2057_v9  ;;  %p1986_p1 = scmp.lt.s32.totalorder (%p291_p11), %s1566_s23, %s1984_s7  ;;  %p1987_p2 = scmp.lt.s32.totalorder (%p291_p11), %s1985_s9, %s1979_s6 }
  0x23   : >> { %1792 = vmatpush3.msk.msra.mxu0 %vm313_vm4, %v2225_v13  ;;  %1797 = vmatprep.mubr.msk.f32.mxu0 %vm2058_vm3, %v2057_v9  ;;  %p1982_p0 = pneg (%p291_p11), %p1981_p13 }
  0x24   : >> { %1793 = vmatprep.subr.mxu0 %v2057_v9  ;;  %p1988_p3 = por (%p291_p11), %p1987_p2, %p1986_p1 }
  0x25   : >> { %1794 = vmatpush3.msra.mxu0 %v2233_v14 }
  0x26   : >> { %1795 = vmatprep.subr.mxu0 %v2057_v9  ;;  %p1989_p4 = pnand (%p291_p11), %p1988_p3, %p1982_p0 }
  0x27   : >> { %1796 = vmatpush3.msra.mxu0 %v2245_v15 }
  0x28   : >> { %1798 = vmatmul.mubr.msk.f32.vlgmr.msra.gmra.mxu0 %vm309_vm5, %v2143_v0  ;;  %1809 = vmatprep.subr.mxu0 %v2057_v9 }
  0x29   : >> { %1810 = vmatpush3.msk.msra.mxu0 %vm313_vm4, %v308_v16  ;;  %1815 = vmatprep.mubr.msk.f32.mxu0 %vm2058_vm3, %v2057_v9 }
  0x2a   : >> { %1811 = vmatprep.subr.mxu0 %v2057_v9 }
  0x2b   : >> { %1812 = vmatpush3.msra.mxu0 %v307_v17 }
  0x2c   : >> { %1813 = vmatprep.subr.mxu0 %v2057_v9 }
  0x2d   : >> { %1814 = vmatpush3.msra.mxu0 %v306_v18 }
  0x2e   : >> { %1816 = vmatmul.mubr.msk.f32.vlgmr.msra.gmra.mxu0 %vm309_vm5, %v2143_v0  ;;  %1827 = vmatprep.subr.mxu0 %v2057_v9 }
  0x2f   : >> { %1828 = vmatpush3.msk.msra.mxu0 %vm313_vm4, %v757_v19  ;;  %1833 = vmatprep.mubr.msk.f32.mxu0 %vm2058_vm3, %v2057_v9 }
  0x30   : >> { %1829 = vmatprep.subr.mxu0 %v2057_v9 }
  0x31   : >> { %1830 = vmatpush3.msra.mxu0 %v756_v20 }
  0x32   : >> { %1831 = vmatprep.subr.mxu0 %v2057_v9 }
  0x33   : >> { %1832 = vmatpush3.msra.mxu0 %v755_v21 }
  0x34   : >> { %1834 = vmatmul.mubr.msk.f32.vlgmr.msra.gmra.mxu0 %vm309_vm5, %v2143_v0  ;;  %1845 = vmatprep.subr.mxu0 %v2057_v9 }
  0x35   : >> { %1846 = vmatpush3.msk.msra.mxu0 %vm313_vm4, %v906_v22  ;;  %1851 = vmatprep.mubr.msk.f32.mxu0 %vm2058_vm3, %v2057_v9 }
  0x36   : >> { %1847 = vmatprep.subr.mxu0 %v2057_v9 }
  0x37   : >> { %1848 = vmatpush3.msra.mxu0 %v905_v23 }
  0x38   : >> { %1849 = vmatprep.subr.mxu0 %v2057_v9 }
  0x39   : >> { %1850 = vmatpush3.msra.mxu0 %v904_v24 }
  0x3a   : >> { %1852 = vmatmul.mubr.msk.f32.vlgmr.msra.gmra.mxu0 %vm309_vm5, %v2143_v0  ;;  %1863 = vmatprep.subr.mxu0 %v2057_v9 }
  0x3b   : >> { %1864 = vmatpush3.msk.msra.mxu0 %vm313_vm4, %v1055_v25  ;;  %1869 = vmatprep.mubr.msk.f32.mxu0 %vm2058_vm3, %v2057_v9 }
  0x3c   : >> { %1865 = vmatprep.subr.mxu0 %v2057_v9 }
  0x3d   : >> { %1866 = vmatpush3.msra.mxu0 %v1054_v26 }
  0x3e   : >> { %1867 = vmatprep.subr.mxu0 %v2057_v9 }
  0x3f   : >> { %1868 = vmatpush3.msra.mxu0 %v1053_v27 }
  0x40   : >> { %1870 = vmatmul.mubr.msk.f32.vlgmr.msra.gmra.mxu0 %vm309_vm5, %v2143_v0  ;;  %1881 = vmatprep.subr.mxu0 %v2057_v9 }
  0x41   : >> { %1882 = vmatpush3.msk.msra.mxu0 %vm313_vm4, %v1204_v28  ;;  %1887 = vmatprep.mubr.msk.f32.mxu0 %vm2058_vm3, %v2057_v9 }
  0x42   : >> { %1883 = vmatprep.subr.mxu0 %v2057_v9 }
  0x43   : >> { %1884 = vmatpush3.msra.mxu0 %v1203_v29 }
  0x44   : >> { %1885 = vmatprep.subr.mxu0 %v2057_v9 }
  0x45   : >> { %1886 = vmatpush3.msra.mxu0 %v1202_v30 }
  0x46   : >> { %1888 = vmatmul.mubr.msk.f32.vlgmr.msra.gmra.mxu0 %vm309_vm5, %v2143_v0  ;;  %1899 = vmatprep.subr.mxu0 %v2057_v9 }
  0x47   : >> { %1900 = vmatpush3.msk.msra.mxu0 %vm313_vm4, %v1353_v31  ;;  %1905 = vmatprep.mubr.msk.f32.mxu0 %vm2058_vm3, %v2057_v9 }
  0x48   : >> { %1901 = vmatprep.subr.mxu0 %v2057_v9 }
  0x49   : >> { %1902 = vmatpush3.msra.mxu0 %v1352_v32 }
  0x4a   : >> { %1903 = vmatprep.subr.mxu0 %v2057_v9 }
  0x4b   : >> { %1904 = vmatpush3.msra.mxu0 %v1351_v33 }
  0x4c   : >> { %1906 = vmatmul.mubr.msk.f32.vlgmr.msra.gmra.mxu0 %vm309_vm5, %v2143_v0 }
  0xe2   : >> { %v383_v34 = vpop.f32.mrf.mxu0 }
  0xe3   : >> { %1789 = vmatmul.mubr.msk.f32.vlgmr.msra.gmra.mxu1 %vm309_vm5, %v383_v34 }
  0xe4   : >> { %v1781_v35 = vpop.f32.mrf.mxu0  ;;  %1801 = vmatpush3.msk.msra.mxu1 %vm313_vm4, %v2162_v4  ;;  %1806 = vmatprep.mubr.msk.f32.mxu1 %vm2058_vm3, %v2057_v9 }
  0xe5   : >> { %1802 = vmatprep.subr.mxu1 %v2057_v9 }
  0xe6   : >> { %1803 = vmatpush3.msra.mxu1 %v2153_v2 }
  0xe7   : >> { %1804 = vmatprep.subr.mxu1 %v2057_v9 }
  0xe8   : >> { %v532_v36 = vpop.f32.mrf.mxu0  ;;  %1805 = vmatpush3.msra.mxu1 %v2148_v1 }
  0xe9   : >> { %1807 = vmatmul.mubr.msk.f32.vlgmr.msra.gmra.mxu1 %vm309_vm5, %v532_v36  ;;  %1818 = vmatprep.subr.mxu1 %v2057_v9 }
  0xea   : >> { %v1799_v37 = vpop.f32.mrf.mxu0  ;;  %1819 = vmatpush3.msk.msra.mxu1 %vm313_vm4, %v2162_v4  ;;  %1824 = vmatprep.mubr.msk.f32.mxu1 %vm2058_vm3, %v2057_v9 }
  0xeb   : >> { %1820 = vmatprep.subr.mxu1 %v2057_v9 }
  0xec   : >> { %1821 = vmatpush3.msra.mxu1 %v2153_v2 }
  0xed   : >> { %1822 = vmatprep.subr.mxu1 %v2057_v9 }
  0xee   : >> { %v678_v38 = vpop.f32.mrf.mxu0  ;;  %1823 = vmatpush3.msra.mxu1 %v2148_v1 }
  0xef   : >> { %1825 = vmatmul.mubr.msk.f32.vlgmr.msra.gmra.mxu1 %vm309_vm5, %v678_v38  ;;  %1836 = vmatprep.subr.mxu1 %v2057_v9 }
  0xf0   : >> { %v1817_v39 = vpop.f32.mrf.mxu0  ;;  %1837 = vmatpush3.msk.msra.mxu1 %vm313_vm4, %v2162_v4  ;;  %1842 = vmatprep.mubr.msk.f32.mxu1 %vm2058_vm3, %v2057_v9 }
  0xf1   : >> { %1838 = vmatprep.subr.mxu1 %v2057_v9 }
  0xf2   : >> { %1839 = vmatpush3.msra.mxu1 %v2153_v2 }
  0xf3   : >> { %1840 = vmatprep.subr.mxu1 %v2057_v9 }
  0xf4   : >> { %v827_v40 = vpop.f32.mrf.mxu0  ;;  %1841 = vmatpush3.msra.mxu1 %v2148_v1 }
  0xf5   : >> { %1843 = vmatmul.mubr.msk.f32.vlgmr.msra.gmra.mxu1 %vm309_vm5, %v827_v40  ;;  %1854 = vmatprep.subr.mxu1 %v2057_v9 }
  0xf6   : >> { %v1835_v41 = vpop.f32.mrf.mxu0  ;;  %1855 = vmatpush3.msk.msra.mxu1 %vm313_vm4, %v2162_v4  ;;  %1860 = vmatprep.mubr.msk.f32.mxu1 %vm2058_vm3, %v2057_v9 }
  0xf7   : >> { %1856 = vmatprep.subr.mxu1 %v2057_v9 }
  0xf8   : >> { %1857 = vmatpush3.msra.mxu1 %v2153_v2 }
  0xf9   : >> { %1858 = vmatprep.subr.mxu1 %v2057_v9 }
  0xfa   : >> { %v976_v42 = vpop.f32.mrf.mxu0  ;;  %1859 = vmatpush3.msra.mxu1 %v2148_v1 }
  0xfb   : >> { %1861 = vmatmul.mubr.msk.f32.vlgmr.msra.gmra.mxu1 %vm309_vm5, %v976_v42  ;;  %1872 = vmatprep.subr.mxu1 %v2057_v9 }
  0xfc   : >> { %v1853_v43 = vpop.f32.mrf.mxu0  ;;  %1873 = vmatpush3.msk.msra.mxu1 %vm313_vm4, %v2162_v4  ;;  %1878 = vmatprep.mubr.msk.f32.mxu1 %vm2058_vm3, %v2057_v9 }
  0xfd   : >> { %1874 = vmatprep.subr.mxu1 %v2057_v9 }
  0xfe   : >> { %1875 = vmatpush3.msra.mxu1 %v2153_v2 }
  0xff   : >> { %1876 = vmatprep.subr.mxu1 %v2057_v9 }
 0x100   : >> { %v1125_v44 = vpop.f32.mrf.mxu0  ;;  %1877 = vmatpush3.msra.mxu1 %v2148_v1 }
 0x101   : >> { %1879 = vmatmul.mubr.msk.f32.vlgmr.msra.gmra.mxu1 %vm309_vm5, %v1125_v44  ;;  %1890 = vmatprep.subr.mxu1 %v2057_v9 }
 0x102   : >> { %v1871_v45 = vpop.f32.mrf.mxu0  ;;  %1891 = vmatpush3.msk.msra.mxu1 %vm313_vm4, %v2162_v4  ;;  %1896 = vmatprep.mubr.msk.f32.mxu1 %vm2058_vm3, %v2057_v9 }
 0x103   : >> { %1892 = vmatprep.subr.mxu1 %v2057_v9 }
 0x104   : >> { %1893 = vmatpush3.msra.mxu1 %v2153_v2 }
 0x105   : >> { %1894 = vmatprep.subr.mxu1 %v2057_v9 }
 0x106   : >> { %v1274_v46 = vpop.f32.mrf.mxu0  ;;  %1895 = vmatpush3.msra.mxu1 %v2148_v1 }
 0x107   : >> { %1897 = vmatmul.mubr.msk.f32.vlgmr.msra.gmra.mxu1 %vm309_vm5, %v1274_v46  ;;  %1908 = vmatprep.subr.mxu1 %v2057_v9 }
 0x108   : >> { %1909 = vmatpush3.msk.msra.mxu1 %vm313_vm4, %v2162_v4  ;;  %v1889_v47 = vpop.f32.mrf.mxu0  ;;  %1914 = vmatprep.mubr.msk.f32.mxu1 %vm2058_vm3, %v2057_v9 }
 0x109   : >> { %1910 = vmatprep.subr.mxu1 %v2057_v9 }
 0x10a   : >> { %1911 = vmatpush3.msra.mxu1 %v2153_v2 }
 0x10b   : >> { %1912 = vmatprep.subr.mxu1 %v2057_v9 }
 0x10c   : >> { %v1423_v48 = vpop.f32.mrf.mxu0  ;;  %1913 = vmatpush3.msra.mxu1 %v2148_v1 }
 0x10d   : >> { %1915 = vmatmul.mubr.msk.f32.vlgmr.msra.gmra.mxu1 %vm309_vm5, %v1423_v48 }
 0x10e   : >> { %v1907_v49 = vpop.f32.mrf.mxu0 }
 0x1a3   : >> { %v459_v50 = vpop.f32.mrf.mxu1 }
 0x1a4   : >> { %v1500_v60 = vmul.f32 %v459_v50, %v459_v50  ;;  %v1513_v32 = vmul.f32 2.0, %v459_v50 }
 0x1a5   : >> { %v1790_v51 = vpop.f32.mrf.mxu1 }
 0x1a9   : >> { %v605_v52 = vpop.f32.mrf.mxu1 }
 0x1aa   : >> { %v1503_v61 = vmul.f32 %v605_v52, %v605_v52  ;;  %vm1533_vm6 = vcmp.gt.f32.partialorder %v459_v50, %v605_v52  ;;  %v1523_v28 = vmul.f32 2.0, %v605_v52 }
 0x1ab   : >> { %v1808_v53 = vpop.f32.mrf.mxu1 }
 0x1af   : >> { %v751_v54 = vpop.f32.mrf.mxu1 }
 0x1b0   : >> { %v1506_v62 = vmul.f32 %v751_v54, %v751_v54  ;;  %v1511_v26 = vmul.f32 %v751_v54, %v605_v52  ;;  %v1509_v29 = vmul.f32 %v751_v54, %v459_v50  ;;  %v1524_v34 = vmul.f32 %v1523_v28, %v751_v54 }
 0x1b1   : >> { %v1826_v55 = vpop.f32.mrf.mxu1  ;;  %v1514_v35 = vmul.f32 %v1513_v32, %v751_v54 }
 0x1b2   : >> { %v1518_v9 = vadd.f32 %v1506_v62, %v1500_v60  ;;  %v1528_v13 = vadd.f32 %v1506_v62, %v1503_v61  ;;  %v1525_v38 = vadd.f32 0.0009, %v1524_v34 }
 0x1b3   : >> { %v1515_v39 = vadd.f32 0.0009, %v1514_v35 }
 0x1b4   : >> { %v1519_v17 = vadd.f32 0.0009, %v1518_v9  ;;  %v1529_v19 = vadd.f32 0.0009, %v1528_v13 }
 0x1b5   : >> { %v900_v56 = vpop.f32.mrf.mxu1 }
 0x1b6   : >> { %v1501_v63 = vsub.f32 %v900_v56, %v1500_v60 }
 0x1b7   : >> { %v1844_v57 = vpop.f32.mrf.mxu1 }
 0x1b8   : >> { %v1502_v11 = vand.u32 2147483647, %v1501_v63 }
 0x1bb   : >> { %v1049_v58 = vpop.f32.mrf.mxu1 }
 0x1bc   : >> { %v1504_v3 = vsub.f32 %v1049_v58, %v1503_v61 }
 0x1bd   : >> { %v1862_v59 = vpop.f32.mrf.mxu1 }
 0x1be   : >> { %v1505_v12 = vand.u32 2147483647, %v1504_v3 }
 0x1c1   : >> { %v1198_v5 = vpop.f32.mrf.mxu1 }
 0x1c2   : >> { %v1507_v6 = vsub.f32 %v1198_v5, %v1506_v62 }
 0x1c3   : >> { %v1880_v10 = vpop.f32.mrf.mxu1 }
 0x1c4   : >> { %v1508_v14 = vand.u32 2147483647, %v1507_v6 }
 0x1c6   : >> { %v1520_v15 = vadd.f32 %v1508_v14, %v1502_v11  ;;  %v1530_v16 = vadd.f32 %v1508_v14, %v1505_v12 }
 0x1c7   : >> { %v1347_v18 = vpop.f32.mrf.mxu1 }
 0x1c8   : >> { %v1521_v20 = vadd.f32 0.0009, %v1520_v15  ;;  %v1531_v21 = vadd.f32 0.0009, %v1530_v16  ;;  %v1510_v33 = vsub.f32 %v1347_v18, %v1509_v29 }
 0x1c9   : >> { %v1898_v22 = vpop.f32.mrf.mxu1 }
 0x1ca   : >> { %v1522_v23 = vmul.f32 %v1521_v20, %v1519_v17  ;;  %v1532_v24 = vmul.f32 %v1531_v21, %v1529_v19  ;;  %v1516_v37 = vadd.f32 0.0009, %v1510_v33 }
 0x1cc   : >> { %v1535_v25 = vsel %vm1533_vm6, %v1522_v23, %v1532_v24  ;;  %v1517_v41 = vmul.f32 %v1516_v37, %v1515_v39 }
 0x1cd   : >> { %1977 = vrcp.f32 %v1535_v25  ;;  %v1496_v27 = vpop.f32.mrf.mxu1 }
 0x1ce   : >> { %v1512_v30 = vsub.f32 %v1496_v27, %v1511_v26 }
 0x1cf   : >> { %v1916_v31 = vpop.f32.mrf.mxu1 }
 0x1d0   : >> { %v1526_v36 = vadd.f32 0.0009, %v1512_v30 }
 0x1d2   : >> { %v1527_v40 = vmul.f32 %v1526_v36, %v1525_v38 }
 0x1d4   : >> { %v1534_v43 = vsel %vm1533_vm6, %v1517_v41, %v1527_v40 }
 0x1da   : >> { %v1978_v42 = vpop.eup %1977 }
 0x1db   : >> { %v1537_v44 = vmul.f32 %v1978_v42, %v1534_v43 }
 0x1dc   : > { %293 = sbr.rel (!%p291_p11) target bundleno = 25 (0x19), region = 91 }
 0x1dd   : >> { %v1538_v45 = vsel %vm2166_vm2, %v1537_v44, 0.0 }
 0x1de   : >> { %v1539_v46 = vadd.f32 %v2051_v8, %v1538_v45  }
 0x1e0   : >> { %v2454_v8 = vmov %v1539_v46  ;;  %1540 = vadd.xlane.f32.xlu0 (%p291_p11), %v1539_v46 }
 0x269   : > { %v1541_v47 = vpop.xlane.xlu0 %1540 }
 0x26a   : > { %v1542_v48 = vrot.slane %v1541_v47, 4 }
 0x26c   : > { %v1543_v49 = vadd.f32 %v1542_v48, %v1541_v47 }
 0x26e   : > { %v1544_v50 = vrot.slane %v1543_v49, 2 }
 0x270   : > { %v1545_v51 = vadd.f32 %v1544_v50, %v1543_v49 }
 0x272   : > { %v1546_v8 = vrot.slane %v1545_v51, 1 }
 0x274   : > { %v1547_v52 = vadd.f32 %v1546_v8, %v1545_v51 }
 0x276   : > { %1918 = vpush %v1547_v52 }
 0x2a7   : > { %s1919_s25 = spop %1918 }
 0x2a8   : > { %v1549_v0 = vstv %s1919_s25 }
 0x2a9   : > { %1550 = vst [vmem:[%s256_s11] sm:$0xff] %v1549_v0 }
 0x2aa   : > { %1992 = shalt.err (!%p1989_p4)
}
 0x2ab   : > { %s1993_s13 = scalar_lea.hbm %s2405_s16, 128  ;;  %s1997_s10 = scalar_lea.hbm %s2449_s5, 256 }
 0x2ac   : > { %p1994_p7 = scmp.ne.s32.totalorder %s2405_s16, %s1993_s13  ;;  %p1998_p10 = scmp.lt.s32.totalorder %s2405_s16, %s2449_s5 }
 0x2ad   : > { %p1999_p11 = scmp.lt.s32.totalorder %s1997_s10, %s1993_s13 }
 0x2ae   : > { %p1995_p8 = pnand %p1994_p7, %p2128_p5 }
 0x2af   : > { %p2000_p12 = por %p1999_p11, %p1998_p10 }
 0x2b0   : > { %p1996_p9 = pneg %p1995_p8 }
 0x2b2   : > { %p2001_p13 = pnand %p2000_p12, %p1996_p9 }
 0x2b4   : > { %2004 = shalt.err (!%p2001_p13)
}
 0x2b5   : > { %1920 = dma.vmem_to_hbm [thread:$0]  (%p2128_p5), %s1566_s23, 128, %s2405_s16, %s1552_s8  }
 0x2b6 PF: > { %p1926_p0 = scmp.ge.s32.totalorder %s2047_s21, 2  ;;  %s1577_s14 = sand.u32 1, %s2035_s18  }
 0x2b7   : > { %s1578_s26 = scalar_lea.sflag [#allocation3], %s1577_s14 }
 0x2b8   : > { %p1923_p1 = pnand %p1926_p0, %p2132_p6 }
 0x2ba   : > { %p1924_p2 = pneg %p1923_p1 }
 0x2bc   : > { %2030 = dma.done.wait (%p1924_p2), %s1578_s26, 128  }
 0x2bd   : > { %2032 = vsyncadd (%p1924_p2), %s1578_s26, 4294967168  ;;  %p15_p3 = scmp.ge.s32.totalorder %s2115_s24, 4   ;;  %s2455_s18 = smov %s2039_s19 }
 0x2be   : > { %s2456_s19 = smov %s2043_s20  ;;  %s2457_s20 = smov %s2126_s27 }
 0x2bf   : > { %s2458_s21 = smov %s2115_s24  ;;  %17 = sbr.rel (!%p15_p3) target bundleno = 3 (0x3), region = 102 }
 0x2c4   :  { %1583 = vsyncpa [#allocation3], 1 }
 0x2c5   :  { %1585 = vsyncpa [#allocation3 + $0x1], 1 }

</bundles_post_ra>
